<compile_context>
chip_gen: v5e
topology: v5e:2x2
jax: 0.10.0
libtpu: 0.0.40
codegen_flags: <defaults>
</compile_context>

<pallas_src>
import jax
import jax.numpy as jnp
from jax.experimental import pallas as pl
from jax.experimental.pallas import tpu as pltpu


def _round_up(a, b):
    return (a + b - 1) // b * b


def _lse_kernel(x_ref, w_ref, b_ref, lse_ref, m_sc, l_sc):
    """Online (streaming) logsumexp over vocab tiles for one row tile."""
    j = pl.program_id(1)

    @pl.when(j == 0)
    def _():
        m_sc[...] = jnp.full(m_sc.shape, -jnp.inf, dtype=m_sc.dtype)
        l_sc[...] = jnp.zeros(l_sc.shape, dtype=l_sc.dtype)

    # bf16 MXU matmul, f32 accumulation.
    logits = jnp.dot(x_ref[...], w_ref[...], preferred_element_type=jnp.float32)
    logits = logits + b_ref[...]                      # f32 bias, broadcasts

    m_prev = m_sc[...]
    m_new = jnp.maximum(m_prev, jnp.max(logits, axis=-1, keepdims=True))
    alpha = jnp.exp(m_prev - m_new)
    l_sc[...] = alpha * l_sc[...] + jnp.sum(
        jnp.exp(logits - m_new), axis=-1, keepdims=True)
    m_sc[...] = m_new

    @pl.when(j == pl.num_programs(1) - 1)
    def _():
        lse_ref[...] = m_sc[...] + jnp.log(l_sc[...])


def _normalize_kernel(x_ref, w_ref, b_ref, lse_ref, o_ref):
    """log_softmax tile: recompute the logits tile, subtract the row LSE."""
    logits = jnp.dot(x_ref[...], w_ref[...], preferred_element_type=jnp.float32)
    logits = logits + b_ref[...]
    o_ref[...] = (logits - lse_ref[...]).astype(o_ref.dtype)


def generator_forward(x, weight, bias, *, tm=256, tn=2048):
    """log_softmax(x @ weight.T + bias, axis=-1).

    x:      (..., d_model) float32
    weight: (vocab, d_model)   -- PyTorch nn.Linear layout
    bias:   (vocab,)
    """
    orig_dtype = x.dtype
    *lead, d_model = x.shape
    vocab = weight.shape[0]
    M = 1
    for s in lead:
        M *= s

    # Effective tiles: row tile is a multiple of 16 (bf16 sublane packing),
    # vocab tile a multiple of 128 (lane-dense, unmasked stores).
    tm_eff = _round_up(min(tm, _round_up(M, 16)), 16)
    tn_eff = _round_up(min(tn, _round_up(vocab, 128)), 128)
    Mp = _round_up(M, tm_eff)
    Vp = _round_up(vocab, tn_eff)
    n_i = Mp // tm_eff
    n_j = Vp // tn_eff

    # bf16 MXU inputs (accumulation is f32 inside the kernels).
    # TODO(synk): in production, pre-store the transposed bf16 weight instead
    # of transposing/casting it on every call.
    x2d = x.reshape(M, d_model)
    if Mp != M:
        x2d = jnp.pad(x2d, ((0, Mp - M), (0, 0)))
    x2d = x2d.astype(jnp.bfloat16)

    w_t = weight.T.astype(jnp.bfloat16)                  # (d_model, vocab)
    b2d = bias.astype(jnp.float32).reshape(1, vocab)
    if Vp != vocab:
        w_t = jnp.pad(w_t, ((0, 0), (0, Vp - vocab)))
        # pad columns get bias = -1e9 -> exp() == 0, never affects the LSE.
        b2d = jnp.pad(b2d, ((0, 0), (0, Vp - vocab)), constant_values=-1e9)

    # VMEM budget from the actual (double-buffered) tile plan; cap at 64 MiB
    # so the same plan also fits v7x.
    est = 2 * (tm_eff * d_model * 2        # x tile (bf16)
               + d_model * tn_eff * 2      # W tile (bf16)
               + tn_eff * 4                # bias tile (f32)
               + tm_eff * tn_eff * 4       # output tile (f32)
               + tm_eff * 4)               # lse tile (f32)
    vmem_limit = int(min(max(3 * est, 32 * 1024 * 1024), 64 * 1024 * 1024))

    x_spec = pl.BlockSpec((tm_eff, d_model), lambda i, j: (i, 0))
    w_spec = pl.BlockSpec((d_model, tn_eff), lambda i, j: (0, j))
    b_spec = pl.BlockSpec((1, tn_eff), lambda i, j: (0, j))
    lse_spec = pl.BlockSpec((tm_eff, 1), lambda i, j: (i, 0))

    # Pass 1: per-row logsumexp over the tiled vocab axis (inner, "arbitrary").
    lse = pl.pallas_call(
        _lse_kernel,
        out_shape=jax.ShapeDtypeStruct((Mp, 1), jnp.float32),
        grid_spec=pltpu.PrefetchScalarGridSpec(
            num_scalar_prefetch=0,
            grid=(n_i, n_j),
            in_specs=[x_spec, w_spec, b_spec],
            out_specs=lse_spec,
            scratch_shapes=[pltpu.VMEM((tm_eff, 1), jnp.float32),
                            pltpu.VMEM((tm_eff, 1), jnp.float32)],
        ),
        compiler_params=pltpu.CompilerParams(
            dimension_semantics=("parallel", "arbitrary"),
            vmem_limit_bytes=vmem_limit,
        ),
    )(x2d, w_t, b2d)

    # Pass 2: recompute the logits tile and write normalized log-probs.
    out = pl.pallas_call(
        _normalize_kernel,
        out_shape=jax.ShapeDtypeStruct((Mp, Vp), jnp.float32),
        grid_spec=pltpu.PrefetchScalarGridSpec(
            num_scalar_prefetch=0,
            grid=(n_i, n_j),
            in_specs=[x_spec, w_spec, b_spec, lse_spec],
            out_specs=pl.BlockSpec((tm_eff, tn_eff), lambda i, j: (i, j)),
        ),
        compiler_params=pltpu.CompilerParams(
            dimension_semantics=("parallel", "parallel"),
            vmem_limit_bytes=vmem_limit,
        ),
    )(x2d, w_t, b2d, lse)

    out = out[:M, :vocab].reshape(*lead, vocab)
    return out.astype(orig_dtype)


if __name__ == "__main__":
    # Small shapes; vocab deliberately NOT a multiple of 128 and rows not a
    # multiple of the row tile, to exercise padding + multi-tile online LSE.
    batch, seq, d_model, vocab = 2, 12, 64, 320

    key = jax.random.PRNGKey(0)
    kx, kw, kb = jax.random.split(key, 3)

    # PyTorch nn.Linear-style init: U(-1/sqrt(d_model), 1/sqrt(d_model)).
    bound = 1.0 / (d_model ** 0.5)
    weight = jax.random.uniform(kw, (vocab, d_model), jnp.float32, -bound, bound)
    bias = jax.random.uniform(kb, (vocab,), jnp.float32, -bound, bound)
    x = jax.random.normal(kx, (batch, seq, d_model), jnp.float32)

    # Pure-f32 JAX reference.
    ref = jax.nn.log_softmax(x @ weight.T + bias, axis=-1)

    # (a) small explicit tiles: multi-tile online LSE + row & vocab padding.
    out_small = jax.block_until_ready(
        generator_forward(x, weight, bias, tm=16, tn=128))
    # (b) default (production) tile sizes, auto-clamped for small shapes.
    out_default = jax.block_until_ready(generator_forward(x, weight, bias))

    for out in (out_small, out_default):
        assert out.shape == (batch, seq, vocab)
        # Rows of a log_softmax must logsumexp to ~0 (internal consistency).
        row_lse = jax.scipy.special.logsumexp(out.astype(jnp.float32), axis=-1)
        assert jnp.max(jnp.abs(row_lse)) < 1e-3, "rows do not normalize"
        # bf16 matmul inputs vs. f32 reference -> modest tolerance.
        assert jnp.max(jnp.abs(out - ref)) < 3e-2, "mismatch vs reference"

    print("KERNEL_OK")
</pallas_src>

<mosaic_0001>
module attributes {stable_mosaic.version = 11 : i64} {
  func.func @_lse_kernel(%arg0: i32, %arg1: i32, %arg2: memref<16x64xbf16, #tpu.memory_space<vmem>>, %arg3: memref<64x128xbf16, #tpu.memory_space<vmem>>, %arg4: memref<1x128xf32, #tpu.memory_space<vmem>>, %arg5: memref<16x1xf32, #tpu.memory_space<vmem>>, %arg6: memref<16x1xf32, #tpu.memory_space<vmem>>, %arg7: memref<16x1xf32, #tpu.memory_space<vmem>>) attributes {dimension_semantics = [#tpu.dimension_semantics<parallel>, #tpu.dimension_semantics<arbitrary>], iteration_bounds = array<i64: 2, 3>, scalar_prefetch = 0 : i64, scratch_operands = 2 : i64, tpu.core_type = #tpu.core_type<tc>, window_params = [{transform_indices = @transform_0, window_bounds = array<i64: 16, 64>}, {transform_indices = @transform_1, window_bounds = array<i64: 64, 128>}, {transform_indices = @transform_2, window_bounds = array<i64: 1, 128>}, {transform_indices = @transform_3, window_bounds = array<i64: 16, 1>}]} {
    %c0_i32 = arith.constant 0 : i32
    %0 = arith.cmpi eq, %arg1, %c0_i32 : i32
    %1 = arith.extui %0 : i1 to i32
    %c0_i32_0 = arith.constant 0 : i32
    %2 = arith.cmpi ne, %1, %c0_i32_0 : i32
    scf.if %2 {
      %cst_17 = arith.constant 0xFF800000 : f32
      %28 = vector.broadcast %cst_17 : f32 to vector<16x1xf32>
      %c0_18 = arith.constant 0 : index
      %c0_19 = arith.constant 0 : index
      %29 = vector.load %arg6[%c0_18, %c0_19] : memref<16x1xf32, #tpu.memory_space<vmem>>, vector<16x1xf32>
      tpu.vector_store %arg6[%c0_18, %c0_19], %28 {strides = array<i32>} : memref<16x1xf32, #tpu.memory_space<vmem>>, vector<16x1xf32>,
      %cst_20 = arith.constant 0.000000e+00 : f32
      %30 = vector.broadcast %cst_20 : f32 to vector<16x1xf32>
      %c0_21 = arith.constant 0 : index
      %c0_22 = arith.constant 0 : index
      %31 = vector.load %arg7[%c0_21, %c0_22] : memref<16x1xf32, #tpu.memory_space<vmem>>, vector<16x1xf32>
      tpu.vector_store %arg7[%c0_21, %c0_22], %30 {strides = array<i32>} : memref<16x1xf32, #tpu.memory_space<vmem>>, vector<16x1xf32>,
    } else {
    }
    %c0 = arith.constant 0 : index
    %c0_1 = arith.constant 0 : index
    %3 = vector.load %arg2[%c0, %c0_1] : memref<16x64xbf16, #tpu.memory_space<vmem>>, vector<16x64xbf16>
    %c0_2 = arith.constant 0 : index
    %c0_3 = arith.constant 0 : index
    %4 = vector.load %arg3[%c0_2, %c0_3] : memref<64x128xbf16, #tpu.memory_space<vmem>>, vector<64x128xbf16>
    %cst = arith.constant dense<0.000000e+00> : vector<16x128xf32>
    %5 = tpu.matmul %3, %4, %cst {dimension_numbers = #tpu.dot_dimension_numbers<[1], [0], [0], [1], [0, 0, 1, 1], [], []>} : vector<16x64xbf16>, vector<64x128xbf16>, vector<16x128xf32> -> vector<16x128xf32>
    %c0_4 = arith.constant 0 : index
    %c0_5 = arith.constant 0 : index
    %6 = vector.load %arg4[%c0_4, %c0_5] : memref<1x128xf32, #tpu.memory_space<vmem>>, vector<1x128xf32>
    %7 = vector.broadcast %6 : vector<1x128xf32> to vector<16x128xf32>
    %8 = arith.addf %5, %7 : vector<16x128xf32>
    %c0_6 = arith.constant 0 : index
    %c0_7 = arith.constant 0 : index
    %9 = vector.load %arg6[%c0_6, %c0_7] : memref<16x1xf32, #tpu.memory_space<vmem>>, vector<16x1xf32>
    %cst_8 = arith.constant dense<0xFF800000> : vector<16xf32>
    %10 = vector.multi_reduction <maximumf>, %8, %cst_8 [1] : vector<16x128xf32> to vector<16xf32>
    %11 = vector.shape_cast %10 : vector<16xf32> to vector<16x1xf32>
    %12 = arith.maximumf %9, %11 : vector<16x1xf32>
    %13 = arith.subf %9, %12 : vector<16x1xf32>
    %14 = math.exp %13 : vector<16x1xf32>
    %c0_9 = arith.constant 0 : index
    %c0_10 = arith.constant 0 : index
    %15 = vector.load %arg7[%c0_9, %c0_10] : memref<16x1xf32, #tpu.memory_space<vmem>>, vector<16x1xf32>
    %16 = arith.mulf %14, %15 : vector<16x1xf32>
    %17 = vector.broadcast %12 : vector<16x1xf32> to vector<16x128xf32>
    %18 = arith.subf %8, %17 : vector<16x128xf32>
    %19 = math.exp %18 : vector<16x128xf32>
    %cst_11 = arith.constant dense<0.000000e+00> : vector<16xf32>
    %20 = vector.multi_reduction <add>, %19, %cst_11 [1] : vector<16x128xf32> to vector<16xf32>
    %21 = vector.shape_cast %20 : vector<16xf32> to vector<16x1xf32>
    %22 = arith.addf %16, %21 : vector<16x1xf32>
    %c0_12 = arith.constant 0 : index
    %c0_13 = arith.constant 0 : index
    %23 = vector.load %arg7[%c0_12, %c0_13] : memref<16x1xf32, #tpu.memory_space<vmem>>, vector<16x1xf32>
    tpu.vector_store %arg7[%c0_12, %c0_13], %22 {strides = array<i32>} : memref<16x1xf32, #tpu.memory_space<vmem>>, vector<16x1xf32>,
    %c0_14 = arith.constant 0 : index
    %c0_15 = arith.constant 0 : index
    %24 = vector.load %arg6[%c0_14, %c0_15] : memref<16x1xf32, #tpu.memory_space<vmem>>, vector<16x1xf32>
    tpu.vector_store %arg6[%c0_14, %c0_15], %12 {strides = array<i32>} : memref<16x1xf32, #tpu.memory_space<vmem>>, vector<16x1xf32>,
    %c2_i32 = arith.constant 2 : i32
    %25 = arith.cmpi eq, %arg1, %c2_i32 : i32
    %26 = arith.extui %25 : i1 to i32
    %c0_i32_16 = arith.constant 0 : i32
    %27 = arith.cmpi ne, %26, %c0_i32_16 : i32
    scf.if %27 {
      %c0_17 = arith.constant 0 : index
      %c0_18 = arith.constant 0 : index
      %28 = vector.load %arg6[%c0_17, %c0_18] : memref<16x1xf32, #tpu.memory_space<vmem>>, vector<16x1xf32>
      %c0_19 = arith.constant 0 : index
      %c0_20 = arith.constant 0 : index
      %29 = vector.load %arg7[%c0_19, %c0_20] : memref<16x1xf32, #tpu.memory_space<vmem>>, vector<16x1xf32>
      %30 = math.log %29 : vector<16x1xf32>
      %31 = arith.addf %28, %30 : vector<16x1xf32>
      %c0_21 = arith.constant 0 : index
      %c0_22 = arith.constant 0 : index
      %32 = vector.load %arg5[%c0_21, %c0_22] : memref<16x1xf32, #tpu.memory_space<vmem>>, vector<16x1xf32>
      tpu.vector_store %arg5[%c0_21, %c0_22], %31 {strides = array<i32>} : memref<16x1xf32, #tpu.memory_space<vmem>>, vector<16x1xf32>,
    } else {
    }
    return
  }
  func.func @transform_0(%arg0: i32, %arg1: i32) -> (i32, i32) {
    %c0_i32 = arith.constant 0 : i32
    %c0_i32_0 = arith.constant 0 : i32
    return %arg0, %c0_i32 : i32, i32
  }
  func.func @transform_1(%arg0: i32, %arg1: i32) -> (i32, i32) {
    %c0_i32 = arith.constant 0 : i32
    %c0_i32_0 = arith.constant 0 : i32
    return %c0_i32, %arg1 : i32, i32
  }
  func.func @transform_2(%arg0: i32, %arg1: i32) -> (i32, i32) {
    %c0_i32 = arith.constant 0 : i32
    %c0_i32_0 = arith.constant 0 : i32
    return %c0_i32, %arg1 : i32, i32
  }
  func.func @transform_3(%arg0: i32, %arg1: i32) -> (i32, i32) {
    %c0_i32 = arith.constant 0 : i32
    %c0_i32_0 = arith.constant 0 : i32
    return %arg0, %c0_i32 : i32, i32
  }
}

</mosaic_0001>

<bundles_post_ra>
// kernel: tpu_custom_call.1
= control target key start
LH: loop header
LB: loop body
LE: loop exit
PB: predicated region body
PF: predicated region fallthrough
CT: control target
= control target key end

     0   :  { %s1149_s0 = inlined_call_operand.hbm [shape: bf16[32,64], index: 0, kind: input, shape index: {}]   ;;  %s1150_s1 = inlined_call_operand.hbm [shape: bf16[64,384], index: 1, kind: input, shape index: {}]   ;;  %s1151_s2 = inlined_call_operand.hbm [shape: f32[1,384], index: 2, kind: input, shape index: {}]   ;;  %s1152_s3 = inlined_call_operand.vmem [shape: f32[32,1], index: 3, kind: output, shape index: {}]  }
   0x1   :  { %1161 = sst [smem:[#allocation18_spill]] %s1150_s1 }
   0x2   :  { %1162 = sst [smem:[#allocation19_spill]] %s1152_s3 }
   0x3   :  { %8 = vsyncpa [#allocation5], 0 }
   0x4   :  { %10 = vsyncpa [#allocation5 + $0x1], 0 }
   0x5   :  { %11 = vsyncpa [#allocation7], 0 }
   0x6   :  { %13 = vsyncpa [#allocation7 + $0x1], 0  ;;  %s913_s12 = smov 0   ;;  %s915_s13 = smov 0  }
   0x7   :  { %s917_s14 = smov 0   ;;  %s919_s15 = smov 0  }
   0x8   :  { %s921_s16 = smov 0   ;;  %s923_s17 = smov 0  }
   0x9   :  { %s925_s18 = smov 0   ;;  %s927_s19 = smov 0  }
   0xa   :  { %s929_s20 = smov 0   ;;  %s931_s21 = smov 0  }
   0xb   :  { %s933_s22 = smov 0  }
   0xc LB: > { %1163 = sst [smem:[#allocation11_spill]] %s865_s17  ;;  %s28_s23 = sadd.s32 1, %s877_s20  ;;  %s885_s22 = sphi %s933_s22, %s19_s22   ;;  %s881_s21 = sphi %s931_s21, %s1190_s21   ;;  %s877_s20 = sphi %s929_s20, %s1197_s20   ;;  %s873_s19 = sphi %s927_s19, %s1188_s19   ;;  %s869_s18 = sphi %s925_s18, %s1196_s18   ;;  %s865_s17 = sphi %s923_s17, %s1187_s17   ;;  %s861_s16 = sphi %s921_s16, %s1195_s16   ;;  %s857_s15 = sphi %s919_s15, %s1194_s15   ;;  %s853_s14 = sphi %s917_s14, %s1193_s14   ;;  %s849_s13 = sphi %s915_s13, %s1192_s13   ;;  %s845_s12 = sphi %s913_s12, %s1191_s12  }
   0xd   : > { %1164 = sst [smem:[#allocation12_spill]] %s869_s18  ;;  %p46_p0 = scmp.eq.s32.totalorder %s885_s22, 0 }
   0xe   : > { %1165 = sst [smem:[#allocation13_spill]] %s881_s21  ;;  %p970_p1 = scmp.ge.s32.totalorder %s28_s23, 3 }
   0xf   : > { %s64_s25 = sadd.s32 1, %s853_s14  ;;  %p71_p2 = scmp.ne.s32.totalorder %s853_s14, %s849_s13 }
  0x10   : > { %p77_p3 = scmp.ne.s32.totalorder %s849_s13, %s845_s12  ;;  %s1199_s23 = smov (%p970_p1, %s28_s23), 0 }
  0x11   : > { %1167 = sst [smem:[#allocation14_spill]] %s1199_s23  ;;  %p985_p4 = por %p71_p2, %p46_p0 }
  0x12   : > { %s61_s27 = ssub.s32 %s877_s20, %s1199_s23  ;;  %p591_p5 = scmp.lt.s32.totalorder %s885_s22, 6 }
  0x13   : > { %p62_p6 = scmp.eq.s32.totalorder %s61_s27, 0  ;;  %s175_s28 = sand.u32 1, %s885_s22  }
  0x14   : > { %s1156_s30 = sand.u32 1, %s853_s14   ;;  %s538_s5 = sshll.u32 %s877_s20, 2 }
  0x15   : > { %s994_s29 = scalar_select %p62_p6, %s853_s14, %s64_s25  }
  0x16   : > { %s537_s4 = sshll.u32 %s1156_s30, 5  ;;  %s1170_s1 = sld [smem:[#allocation18_spill]] }
  0x17   : > { %1169 = sst [smem:[#allocation15_spill]] %s994_s29  ;;  %s179_s10 = scalar_lea.vmem [#allocation6], %s537_s4 }
  0x18   : > { %s186_s11 = sshll.u32 %s179_s10, 4  ;;  %p1007_p7 = pnand %p591_p5, %p985_p4  ;;  %s187_s11 = int_to_ptr.vmem [resolvable:$true] %s186_s11 }
  0x19   : > { %p539_p8 = scmp.ge.s32.totalorder %s885_s22, 1  ;;  %p211_p9 = scmp.lt.s32.totalorder %s885_s22, 7 }
  0x1a   : > { %s1013_s27 = scalar_lea.sflag [#allocation7], %s175_s28  ;;  %s887_s4 = smov 192  }
  0x1b   : > { %s1155_s26 = smov 4   ;;  %p1020_p10 = pnand %p539_p8, %p211_p9 }
  0x1c   : > { %s183_s8 = scalar_lea.hbm %s1170_s1, %s538_s5  ;;  %s1154_s5 = smov 64  }
  0x1d   : > { %s184_s9 = sshll.u32 %s183_s8, 4  ;;  %s1153_s7 = sadd.s32 4294967295, %s885_s22   ;;  %s185_s9 = int_to_ptr.hbm [resolvable:$true] %s184_s9 }
  0x1e   : > { %587 = dma.hbm_to_vmem [thread:$0]  (!%p1007_p7), %s185_s9, 512, %s187_s11, %s1013_s27, %s887_s4, %s1154_s5, %s1155_s26  }
  0x1f   : > { %s31_s28 = sadd.s32 1, %s881_s21  ;;  %s38_s8 = sadd.s32 1, %s865_s17 }
  0x20   : > { %s1201_s28 = smov (!%p970_p1, %s31_s28), %s881_s21  ;;  %p45_p11 = scmp.ne.s32.totalorder %s865_s17, %s861_s16 }
  0x21   : > { %p33_p12 = scmp.ge.s32.totalorder %s1201_s28, 2  ;;  %p51_p13 = scmp.ne.s32.totalorder %s861_s16, %s857_s15 }
  0x22   : > { %p1036_p2 = por %p46_p0, %p45_p11  ;;  %p52_p4 = scmp.eq.s32.totalorder %s1153_s7, 0 }
  0x23   : > { %s1203_s28 = smov (%p33_p12, %s1201_s28), 0  ;;  %s153_s11 = sand.u32 1, %s865_s17  }
  0x24   : > { %1174 = sst [smem:[#allocation16_spill]] %s1203_s28  ;;  %p1044_p6 = por %p52_p4, %p51_p13 }
  0x25   : > { %p1051_p1 = por %p77_p3, %p52_p4  ;;  %s35_s9 = ssub.s32 %s881_s21, %s1203_s28 }
  0x26   : > { %p36_p0 = scmp.eq.s32.totalorder %s35_s9, 0  ;;  %s534_s4 = sshll.u32 %s153_s11, 3 }
  0x27   : > { %s569_s7 = sshll.u32 %s881_s21, 3  ;;  %s157_s12 = scalar_lea.vmem [#allocation4], %s534_s4 }
  0x28   : > { %s1060_s5 = scalar_select %p36_p0, %s865_s17, %s38_s8  }
  0x29   : > { %s162_s1 = scalar_lea.hbm %s1149_s0, %s569_s7  ;;  %s165_s29 = sshll.u32 %s157_s12, 4  ;;  %s166_s29 = int_to_ptr.vmem [resolvable:$true] %s165_s29 }
  0x2a   : > { %1177 = sst [smem:[#allocation17_spill]] %s1060_s5  ;;  %s163_s23 = sshll.u32 %s162_s1, 4  ;;  %s164_s23 = int_to_ptr.hbm [resolvable:$true] %s163_s23 }
  0x2b   : > { %p582_p3 = pnand %p591_p5, %p1036_p2  ;;  %s202_s21 = scalar_lea.hbm %s1151_s2, %s877_s20 }
  0x2c   : > { %s1178_s8 = sand.u32 1, %s853_s14   ;;  %s204_s18 = sshll.u32 %s202_s21, 4  ;;  %s205_s18 = int_to_ptr.hbm [resolvable:$true] %s204_s18 }
  0x2d   : > { %s199_s5 = scalar_lea.vmem [#allocation8], %s1178_s8  ;;  %s154_s30 = scalar_lea.sflag [#allocation5], %s153_s11 }
  0x2e   : > { %s206_s17 = sshll.u32 %s199_s5, 4  ;;  %s1179_s26 = smov 4   ;;  %s207_s17 = int_to_ptr.vmem [resolvable:$true] %s206_s17 }
  0x2f   : > { %s1180_s3 = smov 64   ;;  %215 = sbr.rel (%p1020_p10) target bundleno = 612 (0x264), region = 32 }
  0x30   : > { %584 = dma.hbm_to_vmem [thread:$0]  (!%p582_p3), %s164_s23, 128, %s166_s29, %s154_s30, %s1180_s3, %s1180_s3, %s1179_s26  }
  0x31   : > { %590 = dma.hbm_to_vmem [thread:$0]  (!%p1007_p7), %s205_s18, 16, %s207_s17, %s1013_s27  }
  0x32   : > { %s217_s1 = sand.u32 (!%p1020_p10), 1, %s861_s16  }
  0x33   : > { %s1084_s7 = sshll.u32 (!%p1020_p10), %s217_s1, 3  ;;  %s218_s5 = scalar_lea.sflag (!%p1020_p10), [#allocation5], %s217_s1 }
  0x34   : > { %s221_s21 = scalar_lea.vmem [#allocation4], %s1084_s7 }
  0x35   : > { %836 = dma.done.wait (%p1044_p6), %s218_s5, 128  }
  0x36   : > { %838 = vsyncadd (%p1044_p6), %s218_s5, 4294967168  ;;  %s1181_s3 = sadd.s32 4294967295, %s885_s22   ;;  %s229_s18 = sand.u32 1, %s849_s13  }
  0x37   : > { %s227_s17 = sand.u32 1, %s1181_s3   ;;  %s541_s23 = sshll.u32 %s229_s18, 5 }
  0x38   : > { %s228_s29 = scalar_lea.sflag [#allocation7], %s227_s17  ;;  %s231_s25 = scalar_lea.vmem [#allocation6], %s541_s23 }
  0x39   : > { %840 = dma.done.wait (%p1051_p1), %s228_s29, 528  }
  0x3a   : > { %842 = vsyncadd (%p1051_p1), %s228_s29, 4294966768  ;;  %s542_s27 = sshll.u32 %s873_s19, 1  ;;  %s1182_s24 = sld [smem:[#allocation19_spill]] }
  0x3b   : > { %p275_p5 = scmp.lt.s32.totalorder %s542_s27, 3  ;;  %s240_s4 = scalar_lea.vmem [#allocation8], %s229_s18 }
  0x3c   : > { %s1183_s12 = sld [smem:[#allocation12_spill]] }
  0x3d   : > { %s1205_s27 = smov (!%p275_p5, %s542_s27), 3 }
  0x3e   : > { %s543_s6 = sshll.u32 %s1205_s27, 3 }
  0x40   : > { %s1102_s11 = scalar_lea.vmem %s1182_s24, %s543_s6 }
  0x42   : > { %p544_p7 = scmp.ne.s32.totalorder %s1183_s12, 0 }
  0x44   : > { %284 = sbr.rel (%p544_p7) target bundleno = 78 (0x4e), region = 48 }
  0x49   : > { %vm285_vm0 = vcmask 7168   ;;  %v890_v0 = vmov -inf   ;;  %v891_v1 = vmov 0.0  }
  0x4a   : > { %286 = vst.msk [vmem:[#allocation2] sm:$0xff] %vm285_vm0, %v890_v0 }
  0x4b   : > { %287 = vst.msk [vmem:[#allocation2 + $0x8] sm:$0xff] %vm285_vm0, %v890_v0 }
  0x4c   : > { %288 = vst.msk [vmem:[#allocation3] sm:$0xff] %vm285_vm0, %v891_v1 }
  0x4d   : > { %289 = vst.msk [vmem:[#allocation3 + $0x8] sm:$0xff] %vm285_vm0, %v891_v1 }
  0x4e PF: > { %v574_v2 = vld [vmem:[%s231_s25 + $0x18] sm:$0xff]  ;;  %v573_v3 = vld [vmem:[%s231_s25 + $0x10] sm:$0xff]  ;;  %v572_v4 = vld [vmem:[%s231_s25 + $0x8] sm:$0xff]  ;;  %vm333_vm1 = vcmask 523264   ;;  %v892_v12 = vmov 0   ;;  %vm391_vm2 = vcmask 7168  }
  0x4f   : > { %341 = vmatpush.bf16.msra.mxu0 %v574_v2  ;;  %v571_v5 = vld [vmem:[%s231_s25] sm:$0xff]  ;;  %v570_v6 = vld [vmem:[%s221_s21] sm:$0xff]  ;;  %686 = vset.pattern.permute.xlu1 %v892_v12  ;;  %s1184_s19 = sld [smem:[#allocation12_spill]] }
  0x50   : > { %v688_v7 = vld [vmem:[%s240_s4] ss:$0 sm:$0xff]  ;;  %687 = vset.pattern.permute.xlu0 %v892_v12 }
  0x51   : > { %v351_v13 = vld [vmem:[#allocation2] sm:$0xff] }
  0x52   : > { %v352_v17 = vld [vmem:[#allocation2 + $0x8] sm:$0xff] }
  0x53   : > { %342 = vmatpush.bf16.msra.mxu0 %v573_v3  ;;  %v365_v32 = vld [vmem:[#allocation3] sm:$0xff] }
  0x54   : > { %v366_v37 = vld [vmem:[#allocation3 + $0x8] sm:$0xff] }
  0x55   : > { %p566_p8 = scmp.ne.s32.totalorder %s1184_s19, 2 }
  0x57   : > { %343 = vmatpush.bf16.msra.mxu0 %v572_v4 }
  0x5b   : > { %344 = vmatpush.bf16.msra.mxu0 %v571_v5 }
  0x5e   : > { %565 = vmatmul.msk.bf16.vlgmr.msra.gmra.mxu0 %vm333_vm1, %v570_v6 }
  0xdb   : > { %v346_v8 = vpop.f32.mrf.mxu0 }
  0xdc   : > { %v347_v9 = vadd.f32 %v688_v7, %v346_v8 }
  0xde   : > { %353 = vmax.xlane.f32.xlu0 %v347_v9 }
  0xe3   : > { %v348_v10 = vpop.f32.mrf.mxu0 }
  0xe4   : > { %v349_v11 = vadd.f32 %v688_v7, %v348_v10 }
  0xe6   : > { %355 = vmax.xlane.f32.xlu0 %v349_v11 }
 0x151   : > { %v354_v14 = vpop.xlane.xlu0 %353 }
 0x152   : > { %v357_v15 = vmax.f32 %v351_v13, %v354_v14 }
 0x154   : > { %v359_v16 = vsub.f32 %v351_v13, %v357_v15  ;;  %394 = vst.msk [vmem:[#allocation2] sm:$0xff] %vm391_vm2, %v357_v15  ;;  %371 = vperm.xlu1 %686, %v357_v15  }
 0x156   : > { %v361_v29 = vmul.f32 1.442695, %v359_v16 }
 0x159   : > { %v356_v18 = vpop.xlane.xlu0 %355 }
 0x15a   : > { %v358_v19 = vmax.f32 %v352_v17, %v356_v18 }
 0x15c   : > { %v360_v20 = vsub.f32 %v352_v17, %v358_v19  ;;  %395 = vst.msk [vmem:[#allocation2 + $0x8] sm:$0xff] %vm391_vm2, %v358_v19  ;;  %376 = vperm.xlu1 %686, %v358_v19  }
 0x15e   : > { %v363_v30 = vmul.f32 1.442695, %v360_v20 }
 0x1c6   : > { %v372_v21 = vpop.permute.xlu1 %371 }
 0x1c7   : > { %v379_v22 = vsub.f32 %v347_v9, %v372_v21 }
 0x1c9   : > { %v381_v23 = vmul.f32 1.442695, %v379_v22 }
 0x1cb   : > { %689 = vpow2.f32 %v381_v23 }
 0x1ce   : > { %v377_v24 = vpop.permute.xlu1 %376 }
 0x1cf   : > { %v380_v25 = vsub.f32 %v349_v11, %v377_v24 }
 0x1d1   : > { %v690_v26 = vpop.eup %689  ;;  %v383_v27 = vmul.f32 1.442695, %v380_v25 }
 0x1d2   : > { %385 = vadd.xlane.f32.xlu2 %v690_v26 }
 0x1d3   : > { %691 = vpow2.f32 %v383_v27 }
 0x1d4   : > { %693 = vpow2.f32 %v361_v29 }
 0x1d5   : > { %695 = vpow2.f32 %v363_v30 }
 0x1d9   : > { %v692_v28 = vpop.eup %691 }
 0x1da   : > { %387 = vadd.xlane.f32.xlu2 %v692_v28  ;;  %v694_v31 = vpop.eup %693 }
 0x1db   : > { %v367_v33 = vmul.f32 %v694_v31, %v365_v32  ;;  %v696_v36 = vpop.eup %695 }
 0x1dc   : > { %v368_v38 = vmul.f32 %v696_v36, %v366_v37 }
 0x245   : > { %v386_v34 = vpop.xlane.xlu2 %385 }
 0x246   : > { %v389_v35 = vadd.f32 %v386_v34, %v367_v33 }
 0x248   : > { %392 = vst.msk [vmem:[#allocation3] sm:$0xff] %vm391_vm2, %v389_v35 }
 0x24c   : > { %399 = sbr.rel (%p566_p8) target bundleno = 612 (0x264), region = 52 }
 0x24d   : > { %v388_v39 = vpop.xlane.xlu2 %387 }
 0x24e   : > { %v390_v40 = vadd.f32 %v388_v39, %v368_v38 }
 0x250   : > { %393 = vst.msk [vmem:[#allocation3 + $0x8] sm:$0xff] %vm391_vm2, %v390_v40 }
 0x251   : > { %v402_v41 = vld [vmem:[#allocation3] sm:$0xff]  ;;  %v400_v44 = vld [vmem:[#allocation2] sm:$0xff]  ;;  %v401_v47 = vld [vmem:[#allocation2 + $0x8] sm:$0xff] }
 0x252   : > { %697 = vlog2.f32 %v402_v41 }
 0x257   : > { %v403_v42 = vld [vmem:[#allocation3 + $0x8] sm:$0xff] }
 0x258   : > { %699 = vlog2.f32 %v403_v42  ;;  %v698_v43 = vpop.eup %697 }
 0x259   : > { %v405_v46 = vmul.f32 0.6931472, %v698_v43 }
 0x25b   : > { %v408_v49 = vadd.f32 %v405_v46, %v400_v44 }
 0x25d   : > { %410 = vst.msk [vmem:[%s1102_s11] sm:$0xff] %vm391_vm2, %v408_v49 }
 0x25e   : > { %v700_v45 = vpop.eup %699 }
 0x25f   : > { %v407_v48 = vmul.f32 0.6931472, %v700_v45 }
 0x261   : > { %v409_v50 = vadd.f32 %v407_v48, %v401_v47 }
 0x263   : > { %411 = vst.msk [vmem:[%s1102_s11 + $0x8] sm:$0xff] %vm391_vm2, %v409_v50 }
 0x264 PF: > { %s19_s22 = sadd.s32 1, %s885_s22   ;;  %s1185_s15 = sld [smem:[#allocation15_spill]] }
 0x265   : > { %p16_p9 = scmp.ge.s32.totalorder %s19_s22, 8   ;;  %s1186_s9 = sld [smem:[#allocation11_spill]] }
 0x266   : > { %s1187_s17 = sld [smem:[#allocation17_spill]]  ;;  %s1191_s12 = smov %s849_s13 }
 0x267   : > { %s1188_s19 = sld [smem:[#allocation13_spill]]  ;;  %s1192_s13 = smov %s853_s14 }
 0x268   : > { %s1189_s8 = sld [smem:[#allocation14_spill]]  ;;  %s1196_s18 = smov %s877_s20 }
 0x269   : > { %s1190_s21 = sld [smem:[#allocation16_spill]] }
 0x26a   : > { %s1193_s14 = smov %s1185_s15  ;;  %s1194_s15 = smov %s861_s16 }
 0x26b   : > { %s1195_s16 = smov %s1186_s9  ;;  %18 = sbr.rel (!%p16_p9) target bundleno = 12 (0xc), region = 104 }
 0x26e   : > { %s1197_s20 = smov %s1189_s8 }
 0x270   :  { %434 = vsyncpa [#allocation5], 1 }
 0x271   :  { %436 = vsyncpa [#allocation5 + $0x1], 1 }
 0x272   :  { %437 = vsyncpa [#allocation7], 1 }
 0x273   :  { %439 = vsyncpa [#allocation7 + $0x1], 1 }

</bundles_post_ra>
